<compile_context>
chip_gen: v5e
topology: v5e:2x2
jax: 0.10.0
libtpu: 0.0.40
codegen_flags: <defaults>
</compile_context>

<pallas_src>
import numpy as np
import jax
import jax.numpy as jnp
from jax import lax
from jax.experimental import pallas as pl
from jax.experimental.pallas import tpu as pltpu

TEMP_LEN = 3


def _adaptive_pool_matrix(in_size: int, out_size: int) -> np.ndarray:
    """Row matrix P (out_size, in_size) reproducing F.adaptive_avg_pool1d bins."""
    P = np.zeros((out_size, in_size), dtype=np.float32)
    for i in range(out_size):
        start = (i * in_size) // out_size
        end = -(-((i + 1) * in_size) // out_size)  # ceil
        P[i, start:end] = 1.0 / (end - start)
    return P


def _tpu_vmem_and_cores():
    """(per-core VMEM bytes, #TensorCores) with conservative (v7x-safe) fallbacks."""
    cap, cores = 64 * 2**20, 1
    try:
        info = pltpu.get_tpu_info()
        cap = int(getattr(info, "vmem_capacity_bytes", cap) or cap)
        for name in ("num_cores", "core_count", "num_tensorcores"):
            v = getattr(info, name, None)
            if v:
                cores = int(v)
                break
    except Exception:
        pass
    return max(cap, 32 * 2**20), cores


# ----------------------------- fused single-pass kernel -----------------------
def _fused_kernel(x_ref, a_ref, w1_ref, b1_ref, eye_ref,
                  p2w_ref, p2b_ref, p3w_ref, p3b_ref, o_ref):
    T = TEMP_LEN
    C = x_ref.shape[2]
    HW = x_ref.shape[3]
    TC = T * C

    a = a_ref[...]                                                  # (1, HW)

    # (a) pooled(32x32)+fc reduction, folded exactly into the per-pixel map A.
    # Done per frame: multiply on the VPU, lane reduce on the XLU (the layout-
    # native direction), keeping the live temporary at (C,HW) not (T,C,HW).
    # (An MXU matvec against an (HW,1) column would force a 128x lane-padded
    #  operand in VMEM, so it is deliberately NOT used.)
    s_cols = []
    for t in range(T):
        frame = x_ref[0, t]                                         # (C, HW)
        s_cols.append(jnp.sum(frame * a, axis=-1, keepdims=True))   # (C, 1)
    s_mat = jnp.concatenate(s_cols, axis=1)                         # (C, T)
    # fc bias is folded into the proj2/proj3 biases by the wrapper.

    # (b) tiny temporal attention, fully in-register (frames stay on lanes).
    p2 = jnp.dot(p2w_ref[...], s_mat,
                 preferred_element_type=jnp.float32) + p2b_ref[...]   # (C, T)
    p3 = jnp.dot(p3w_ref[...], s_mat,
                 preferred_element_type=jnp.float32) + p3b_ref[...]   # (C, T)
    logits = lax.dot_general(p2, p3, (((0,), (0,)), ((), ())),
                             preferred_element_type=jnp.float32) * (1.0 / C)  # (T,T)[i,j]
    logits = logits - jnp.max(logits, axis=-1, keepdims=True)
    e = jnp.exp(logits)
    tw = e / jnp.sum(e, axis=-1, keepdims=True)                     # tw[i_in, j_out]
    beta = jnp.sum(tw, axis=0, keepdims=True)                       # (1, T): sum_i tw[i, j]

    # (c) fold tw + 1x1-conv weight + residual identity into one (TC, TC)
    # matrix and a (TC, 1) bias; apply with a single MXU dot over the group.
    w1 = w1_ref[...]                                                # (C, C)
    b1 = b1_ref[...]                                                # (C, 1)
    m_rows, b_rows = [], []
    for j in range(T):
        m_rows.append(jnp.concatenate(
            [tw[i:i + 1, j:j + 1] * w1 for i in range(T)], axis=1))  # (C, TC)
        b_rows.append(beta[0:1, j:j + 1] * b1)                       # (C, 1)
    M = jnp.concatenate(m_rows, axis=0) + eye_ref[...]               # (TC, TC)
    bias = jnp.concatenate(b_rows, axis=0)                           # (TC, 1)

    # TODO(synk): for very large C (TC >= ~256) optionally cast M/xcat to bf16
    # (f32 accumulation) to cut MXU passes; kept f32 here for exact parity.
    xcat = x_ref[0].reshape(TC, HW)                                  # free leading-dim merge
    out = jnp.dot(M, xcat, preferred_element_type=jnp.float32) + bias
    o_ref[...] = out.reshape(1, T, C, HW)


def _fused_call(x_grouped, a_row, w1, b1, eye_tc, p2w, p2b, p3w, p3b,
                *, single_buffer, vmem_limit):
    G, T, C, HW = x_grouped.shape
    TC = T * C
    xmap = lambda g: (g, 0, 0, 0)
    if single_buffer:
        # Single-buffered group in/out (halves the resident footprint; extends
        # the fused-path size ceiling on v7x's 64 MiB/TC at the cost of overlap).
        x_spec = pl.BlockSpec((1, T, C, HW), xmap, pipeline_mode=pl.Buffered(1))
        o_spec = pl.BlockSpec((1, T, C, HW), xmap, pipeline_mode=pl.Buffered(1))
    else:
        x_spec = pl.BlockSpec((1, T, C, HW), xmap)
        o_spec = pl.BlockSpec((1, T, C, HW), xmap)

    return pl.pallas_call(
        _fused_kernel,
        out_shape=jax.ShapeDtypeStruct((G, T, C, HW), jnp.float32),
        grid_spec=pltpu.PrefetchScalarGridSpec(
            num_scalar_prefetch=0,
            grid=(G,),
            in_specs=[
                x_spec,                                            # x group
                pl.BlockSpec((1, HW), lambda g: (0, 0)),           # pooled-fc map A
                pl.BlockSpec((C, C), lambda g: (0, 0)),            # proj1 weight
                pl.BlockSpec((C, 1), lambda g: (0, 0)),            # proj1 bias
                pl.BlockSpec((TC, TC), lambda g: (0, 0)),          # identity (residual fold)
                pl.BlockSpec((C, C), lambda g: (0, 0)),            # proj2 weight
                pl.BlockSpec((C, 1), lambda g: (0, 0)),            # proj2 bias (+fc_b fold)
                pl.BlockSpec((C, C), lambda g: (0, 0)),            # proj3 weight
                pl.BlockSpec((C, 1), lambda g: (0, 0)),            # proj3 bias (+fc_b fold)
            ],
            out_specs=o_spec,
        ),
        compiler_params=pltpu.CompilerParams(
            dimension_semantics=("parallel",),
            vmem_limit_bytes=int(vmem_limit)),
    )(x_grouped, a_row, w1, b1, eye_tc, p2w, p2b, p3w, p3b)


# -------------------------- lane-tiled fallback kernel -------------------------
def _tiled_kernel(x_ref, m_ref, bias_ref, o_ref):
    # x_ref: (1, T, C, HWT)   m_ref: (1, TC, TC)   bias_ref: (1, TC, 1)
    _, T, C, HWT = x_ref.shape
    TC = T * C
    xcat = x_ref[0].reshape(TC, HWT)          # free reshape: frames stacked on sublanes
    out = jnp.dot(m_ref[0], xcat, preferred_element_type=jnp.float32) + bias_ref[0]
    o_ref[...] = out.reshape(1, T, C, HWT)


def _pick_hw_tile(HW, C, T, vmem_cap):
    # generation-aware block budget: ~2.5 MiB on v7x (64 MiB), ~5 MiB on v5e/v6e (128 MiB)
    budget = min(8 << 20, max(2 << 20, vmem_cap // 24))
    max_tile = max(128, (budget // (T * C * 4)) // 128 * 128)
    if HW <= max_tile:
        return HW                     # single full-extent block (always legal)
    return max_tile                   # 128-multiple; last block may be partial (cdiv grid)


def _tiled_call(x_grouped, a_hw, params, w1, vmem_cap, hw_tile=None):
    G, T, C, HW = x_grouped.shape
    TC = T * C
    # spatial (pool + fc) reduction + temporal attention glue in plain XLA
    s = jnp.tensordot(x_grouped, a_hw, axes=([3], [0])) + params["fc_b"][0]   # (G, T, C)
    p2 = s @ params["p2_w"].T + params["p2_b"]
    p3 = s @ params["p3_w"].T + params["p3_b"]
    tw = jax.nn.softmax(jnp.einsum("gic,gjc->gij", p2, p3) / C, axis=-1)      # (G, T, T)
    # fold temporal weights + 1x1-conv weight + residual identity into one matrix
    M = (jnp.einsum("gij,ck->gjcik", tw, w1).reshape(G, TC, TC)
         + jnp.eye(TC, dtype=jnp.float32)[None])
    bias = (jnp.sum(tw, axis=1)[:, :, None]
            * params["p1_b"][None, None, :]).reshape(G, TC, 1)

    if hw_tile is None:
        hw_tile = _pick_hw_tile(HW, C, T, vmem_cap)
    n_tiles = pl.cdiv(HW, hw_tile)
    block_bytes = T * C * hw_tile * 4
    need = 6 * block_bytes + 2 * TC * max(TC, 128) * 4 + (2 << 20)
    vmem_limit = int(min(vmem_cap, max(16 << 20, need)))

    return pl.pallas_call(
        _tiled_kernel,
        out_shape=jax.ShapeDtypeStruct((G, T, C, HW), jnp.float32),
        grid_spec=pltpu.PrefetchScalarGridSpec(
            num_scalar_prefetch=0,
            grid=(G, n_tiles),
            in_specs=[
                pl.BlockSpec((1, T, C, hw_tile), lambda g, p: (g, 0, 0, p)),
                pl.BlockSpec((1, TC, TC), lambda g, p: (g, 0, 0)),
                pl.BlockSpec((1, TC, 1), lambda g, p: (g, 0, 0)),
            ],
            out_specs=pl.BlockSpec((1, T, C, hw_tile), lambda g, p: (g, 0, 0, p)),
        ),
        compiler_params=pltpu.CompilerParams(
            dimension_semantics=("parallel", "parallel"),
            vmem_limit_bytes=vmem_limit),
    )(x_grouped, M.astype(jnp.float32), bias.astype(jnp.float32))


# ------------------------------------ forward ----------------------------------
def global_agg_forward(x, params, *, force_tiled=False, force_single_buffer=False,
                       hw_tile=None):
    B, C, H, W = x.shape
    assert B % TEMP_LEN == 0, "batch must be a multiple of TEMP_LEN"
    T = TEMP_LEN
    G = B // T
    HW = H * W
    TC = T * C

    # Fold adaptive_avg_pool2d((32,32)) + fc(1024->1) into one exact per-pixel map A.
    Ph = jnp.asarray(_adaptive_pool_matrix(H, 32))
    Pw = jnp.asarray(_adaptive_pool_matrix(W, 32))
    wfc2d = params["fc_w"].reshape(32, 32)
    A = (Ph.T @ wfc2d) @ Pw                                    # (H, W)
    a_row = A.reshape(1, HW).astype(jnp.float32)

    x_grouped = x.reshape(G, T, C, HW)
    w1 = params["p1_w"][:, :, 0, 0]                            # (C, C)
    b1 = params["p1_b"].reshape(C, 1)
    # fold the scalar fc bias into the proj2/proj3 biases: proj(s+b*1)=proj(s)+b*rowsum(W)
    fcb = params["fc_b"].reshape(())
    p2b = (params["p2_b"] + fcb * jnp.sum(params["p2_w"], axis=1)).reshape(C, 1)
    p3b = (params["p3_b"] + fcb * jnp.sum(params["p3_w"], axis=1)).reshape(C, 1)
    eye_tc = jnp.eye(TC, dtype=jnp.float32)

    vmem_cap, num_cores = _tpu_vmem_and_cores()
    vmem_budget = int(0.75 * vmem_cap)
    group_bytes = T * C * HW * 4
    weight_bytes = (8 * HW + 3 * C * C + 3 * C + TC * max(TC, 128)) * 4
    need_db = 5 * group_bytes + weight_bytes + (1 << 20)       # double-buffered x in/out + temps
    need_sb = 3 * group_bytes + weight_bytes + (1 << 20)       # pl.Buffered(1) x in/out + temps

    # On a multi-TensorCore chip (v7x) with fewer groups than cores, prefer the
    # tiled path: its 2-D parallel grid feeds every core (fused grid=(G,) cannot).
    prefer_tiled = (num_cores >= 2 and G < num_cores and HW >= 256)

    use_fused = (not force_tiled) and (
        force_single_buffer or (not prefer_tiled and min(need_db, need_sb) <= vmem_budget))

    if use_fused:
        single = force_single_buffer or need_db > vmem_budget
        need = need_sb if single else need_db
        vmem_limit = int(min(vmem_cap, max(16 << 20, need + (2 << 20))))
        try:
            out = _fused_call(x_grouped, a_row, w1, b1, eye_tc,
                              params["p2_w"], p2b, params["p3_w"], p3b,
                              single_buffer=single, vmem_limit=vmem_limit)
            return out.reshape(B, C, H, W)
        except Exception:
            if not single:
                raise
            # pl.Buffered(1) unavailable / rejected on this build -> tiled fallback.
    out = _tiled_call(x_grouped, a_row[0], params, w1, vmem_cap, hw_tile)
    return out.reshape(B, C, H, W)


# ------------------------------ pure-JAX reference -----------------------------
def init_params(c, key):
    ks = jax.random.split(key, 8)
    return {
        "fc_w": jax.random.normal(ks[0], (1, 32 * 32), jnp.float32) * 0.05,
        "fc_b": jax.random.normal(ks[1], (1,), jnp.float32) * 0.05,
        "p1_w": jax.random.normal(ks[2], (c, c, 1, 1), jnp.float32) * 0.1,
        "p1_b": jax.random.normal(ks[3], (c,), jnp.float32) * 0.1,
        "p2_w": jax.random.normal(ks[4], (c, c), jnp.float32) * 0.1,
        "p2_b": jax.random.normal(ks[5], (c,), jnp.float32) * 0.1,
        "p3_w": jax.random.normal(ks[6], (c, c), jnp.float32) * 0.1,
        "p3_b": jax.random.normal(ks[7], (c,), jnp.float32) * 0.1,
    }


def reference_forward(x, params):
    B, C, H, W = x.shape
    G = B // TEMP_LEN
    w1 = params["p1_w"][:, :, 0, 0]
    x_proj1 = jnp.einsum("oc,bchw->bohw", w1, x) + params["p1_b"][None, :, None, None]
    Ph = jnp.asarray(_adaptive_pool_matrix(H, 32))
    Pw = jnp.asarray(_adaptive_pool_matrix(W, 32))
    xd = jnp.einsum("ih,bchw,jw->bcij", Ph, x, Pw).reshape(B, C, 32 * 32)
    s = xd @ params["fc_w"][0] + params["fc_b"][0]
    sv = s.reshape(G, TEMP_LEN, C)
    p2 = sv @ params["p2_w"].T + params["p2_b"]
    p3 = sv @ params["p3_w"].T + params["p3_b"]
    tw = jax.nn.softmax(jnp.einsum("gtc,gsc->gts", p2, p3) / C, axis=-1)
    xp = x_proj1.reshape(G, TEMP_LEN, C, H, W)
    wf = jnp.einsum("gichw,gij->gjchw", xp, tw)
    return x + wf.reshape(B, C, H, W)


if __name__ == "__main__":
    B, C, H, W = 6, 8, 32, 32            # B must be a multiple of TEMP_LEN=3
    key = jax.random.PRNGKey(0)
    kx, kp = jax.random.split(key)
    x = jax.random.normal(kx, (B, C, H, W), jnp.float32)
    params = init_params(C, kp)

    ref = jax.block_until_ready(reference_forward(x, params))

    # auto-selected path (fused, double-buffered at this size): one HBM read of x
    out_fused = jax.block_until_ready(global_agg_forward(x, params))
    np.testing.assert_allclose(np.asarray(out_fused), np.asarray(ref),
                               rtol=2e-3, atol=2e-3)

    # single-buffered fused variant (extends the fused ceiling on v7x's 64 MiB VMEM)
    out_sb = jax.block_until_ready(
        global_agg_forward(x, params, force_single_buffer=True))
    np.testing.assert_allclose(np.asarray(out_sb), np.asarray(ref),
                               rtol=2e-3, atol=2e-3)

    # lane-tiled fallback (cdiv partial tiles), forced at hw_tile=512 to validate it
    out_tiled = jax.block_until_ready(
        global_agg_forward(x, params, force_tiled=True, hw_tile=512))
    np.testing.assert_allclose(np.asarray(out_tiled), np.asarray(ref),
                               rtol=2e-3, atol=2e-3)

    print("KERNEL_OK")
</pallas_src>

<mosaic_0001>
module attributes {stable_mosaic.version = 11 : i64} {
  func.func @_fused_kernel(%arg0: i32, %arg1: memref<1x3x8x1024xf32, #tpu.memory_space<vmem>>, %arg2: memref<1x1024xf32, #tpu.memory_space<vmem>>, %arg3: memref<8x8xf32, #tpu.memory_space<vmem>>, %arg4: memref<8x1xf32, #tpu.memory_space<vmem>>, %arg5: memref<24x24xf32, #tpu.memory_space<vmem>>, %arg6: memref<8x8xf32, #tpu.memory_space<vmem>>, %arg7: memref<8x1xf32, #tpu.memory_space<vmem>>, %arg8: memref<8x8xf32, #tpu.memory_space<vmem>>, %arg9: memref<8x1xf32, #tpu.memory_space<vmem>>, %arg10: memref<1x3x8x1024xf32, #tpu.memory_space<vmem>>) attributes {dimension_semantics = [#tpu.dimension_semantics<parallel>], iteration_bounds = array<i64: 2>, scalar_prefetch = 0 : i64, scratch_operands = 0 : i64, tpu.core_type = #tpu.core_type<tc>, window_params = [{transform_indices = @transform_0, window_bounds = array<i64: 1, 3, 8, 1024>}, {pipeline_mode = #tpu.pipeline_mode<synchronous>, transform_indices = @transform_1, window_bounds = array<i64: 1, 1024>}, {pipeline_mode = #tpu.pipeline_mode<synchronous>, transform_indices = @transform_2, window_bounds = array<i64: 8, 8>}, {pipeline_mode = #tpu.pipeline_mode<synchronous>, transform_indices = @transform_3, window_bounds = array<i64: 8, 1>}, {pipeline_mode = #tpu.pipeline_mode<synchronous>, transform_indices = @transform_4, window_bounds = array<i64: 24, 24>}, {pipeline_mode = #tpu.pipeline_mode<synchronous>, transform_indices = @transform_5, window_bounds = array<i64: 8, 8>}, {pipeline_mode = #tpu.pipeline_mode<synchronous>, transform_indices = @transform_6, window_bounds = array<i64: 8, 1>}, {pipeline_mode = #tpu.pipeline_mode<synchronous>, transform_indices = @transform_7, window_bounds = array<i64: 8, 8>}, {pipeline_mode = #tpu.pipeline_mode<synchronous>, transform_indices = @transform_8, window_bounds = array<i64: 8, 1>}, {transform_indices = @transform_9, window_bounds = array<i64: 1, 3, 8, 1024>}]} {
    %c0 = arith.constant 0 : index
    %c0_0 = arith.constant 0 : index
    %0 = vector.load %arg2[%c0, %c0_0] : memref<1x1024xf32, #tpu.memory_space<vmem>>, vector<1x1024xf32>
    %c0_1 = arith.constant 0 : index
    %c0_2 = arith.constant 0 : index
    %c0_3 = arith.constant 0 : index
    %c0_4 = arith.constant 0 : index
    %1 = vector.load %arg1[%c0_1, %c0_2, %c0_3, %c0_4] : memref<1x3x8x1024xf32, #tpu.memory_space<vmem>>, vector<1x1x8x1024xf32>
    %2 = vector.shape_cast %1 : vector<1x1x8x1024xf32> to vector<8x1024xf32>
    %3 = vector.broadcast %0 : vector<1x1024xf32> to vector<8x1024xf32>
    %4 = arith.mulf %2, %3 : vector<8x1024xf32>
    %cst = arith.constant dense<0.000000e+00> : vector<8xf32>
    %5 = vector.multi_reduction <add>, %4, %cst [1] : vector<8x1024xf32> to vector<8xf32>
    %6 = vector.shape_cast %5 : vector<8xf32> to vector<8x1xf32>
    %c0_5 = arith.constant 0 : index
    %c1 = arith.constant 1 : index
    %c0_6 = arith.constant 0 : index
    %c0_7 = arith.constant 0 : index
    %7 = vector.load %arg1[%c0_5, %c1, %c0_6, %c0_7] : memref<1x3x8x1024xf32, #tpu.memory_space<vmem>>, vector<1x1x8x1024xf32>
    %8 = vector.shape_cast %7 : vector<1x1x8x1024xf32> to vector<8x1024xf32>
    %9 = vector.broadcast %0 : vector<1x1024xf32> to vector<8x1024xf32>
    %10 = arith.mulf %8, %9 : vector<8x1024xf32>
    %cst_8 = arith.constant dense<0.000000e+00> : vector<8xf32>
    %11 = vector.multi_reduction <add>, %10, %cst_8 [1] : vector<8x1024xf32> to vector<8xf32>
    %12 = vector.shape_cast %11 : vector<8xf32> to vector<8x1xf32>
    %c0_9 = arith.constant 0 : index
    %c2 = arith.constant 2 : index
    %c0_10 = arith.constant 0 : index
    %c0_11 = arith.constant 0 : index
    %13 = vector.load %arg1[%c0_9, %c2, %c0_10, %c0_11] : memref<1x3x8x1024xf32, #tpu.memory_space<vmem>>, vector<1x1x8x1024xf32>
    %14 = vector.shape_cast %13 : vector<1x1x8x1024xf32> to vector<8x1024xf32>
    %15 = vector.broadcast %0 : vector<1x1024xf32> to vector<8x1024xf32>
    %16 = arith.mulf %14, %15 : vector<8x1024xf32>
    %cst_12 = arith.constant dense<0.000000e+00> : vector<8xf32>
    %17 = vector.multi_reduction <add>, %16, %cst_12 [1] : vector<8x1024xf32> to vector<8xf32>
    %18 = vector.shape_cast %17 : vector<8xf32> to vector<8x1xf32>
    %19 = tpu.concatenate %6, %12, %18 in 1 : vector<8x1xf32>, vector<8x1xf32>, vector<8x1xf32> -> vector<8x3xf32>
    %c0_13 = arith.constant 0 : index
    %c0_14 = arith.constant 0 : index
    %20 = vector.load %arg6[%c0_13, %c0_14] : memref<8x8xf32, #tpu.memory_space<vmem>>, vector<8x8xf32>
    %cst_15 = arith.constant dense<0.000000e+00> : vector<8x3xf32>
    %21 = tpu.matmul %20, %19, %cst_15 {dimension_numbers = #tpu.dot_dimension_numbers<[1], [0], [0], [1], [0, 0, 1, 1], [], []>} : vector<8x8xf32>, vector<8x3xf32>, vector<8x3xf32> -> vector<8x3xf32>
    %c0_16 = arith.constant 0 : index
    %c0_17 = arith.constant 0 : index
    %22 = vector.load %arg7[%c0_16, %c0_17] : memref<8x1xf32, #tpu.memory_space<vmem>>, vector<8x1xf32>
    %23 = vector.broadcast %22 : vector<8x1xf32> to vector<8x3xf32>
    %24 = arith.addf %21, %23 : vector<8x3xf32>
    %c0_18 = arith.constant 0 : index
    %c0_19 = arith.constant 0 : index
    %25 = vector.load %arg8[%c0_18, %c0_19] : memref<8x8xf32, #tpu.memory_space<vmem>>, vector<8x8xf32>
    %cst_20 = arith.constant dense<0.000000e+00> : vector<8x3xf32>
    %26 = tpu.matmul %25, %19, %cst_20 {dimension_numbers = #tpu.dot_dimension_numbers<[1], [0], [0], [1], [0, 0, 1, 1], [], []>} : vector<8x8xf32>, vector<8x3xf32>, vector<8x3xf32> -> vector<8x3xf32>
    %c0_21 = arith.constant 0 : index
    %c0_22 = arith.constant 0 : index
    %27 = vector.load %arg9[%c0_21, %c0_22] : memref<8x1xf32, #tpu.memory_space<vmem>>, vector<8x1xf32>
    %28 = vector.broadcast %27 : vector<8x1xf32> to vector<8x3xf32>
    %29 = arith.addf %26, %28 : vector<8x3xf32>
    %cst_23 = arith.constant dense<0.000000e+00> : vector<3x3xf32>
    %30 = tpu.matmul %24, %29, %cst_23 {dimension_numbers = #tpu.dot_dimension_numbers<[0], [0], [1], [1], [0, 1, 1, 1], [], []>} : vector<8x3xf32>, vector<8x3xf32>, vector<3x3xf32> -> vector<3x3xf32>
    %cst_24 = arith.constant 1.250000e-01 : f32
    %31 = vector.broadcast %cst_24 : f32 to vector<3x3xf32>
    %32 = arith.mulf %30, %31 : vector<3x3xf32>
    %cst_25 = arith.constant dense<0xFF800000> : vector<3xf32>
    %33 = vector.multi_reduction <maximumf>, %32, %cst_25 [1] : vector<3x3xf32> to vector<3xf32>
    %34 = vector.shape_cast %33 : vector<3xf32> to vector<3x1xf32>
    %35 = vector.broadcast %34 : vector<3x1xf32> to vector<3x3xf32>
    %36 = arith.subf %32, %35 : vector<3x3xf32>
    %37 = math.exp %36 : vector<3x3xf32>
    %cst_26 = arith.constant dense<0.000000e+00> : vector<3xf32>
    %38 = vector.multi_reduction <add>, %37, %cst_26 [1] : vector<3x3xf32> to vector<3xf32>
    %39 = vector.shape_cast %38 : vector<3xf32> to vector<3x1xf32>
    %40 = vector.broadcast %39 : vector<3x1xf32> to vector<3x3xf32>
    %41 = arith.divf %37, %40 : vector<3x3xf32>
    %cst_27 = arith.constant dense<0.000000e+00> : vector<3xf32>
    %42 = vector.multi_reduction <add>, %41, %cst_27 [0] : vector<3x3xf32> to vector<3xf32>
    %43 = vector.shape_cast %42 : vector<3xf32> to vector<1x3xf32>
    %c0_28 = arith.constant 0 : index
    %c0_29 = arith.constant 0 : index
    %44 = vector.load %arg3[%c0_28, %c0_29] : memref<8x8xf32, #tpu.memory_space<vmem>>, vector<8x8xf32>
    %c0_30 = arith.constant 0 : index
    %c0_31 = arith.constant 0 : index
    %45 = vector.load %arg4[%c0_30, %c0_31] : memref<8x1xf32, #tpu.memory_space<vmem>>, vector<8x1xf32>
    %46 = vector.extract_strided_slice %41 {offsets = [0, 0], sizes = [1, 1], strides = [1, 1]} : vector<3x3xf32> to vector<1x1xf32>
    %47 = vector.broadcast %46 : vector<1x1xf32> to vector<8x8xf32>
    %48 = arith.mulf %47, %44 : vector<8x8xf32>
    %49 = vector.extract_strided_slice %41 {offsets = [1, 0], sizes = [1, 1], strides = [1, 1]} : vector<3x3xf32> to vector<1x1xf32>
    %50 = vector.broadcast %49 : vector<1x1xf32> to vector<8x8xf32>
    %51 = arith.mulf %50, %44 : vector<8x8xf32>
    %52 = vector.extract_strided_slice %41 {offsets = [2, 0], sizes = [1, 1], strides = [1, 1]} : vector<3x3xf32> to vector<1x1xf32>
    %53 = vector.broadcast %52 : vector<1x1xf32> to vector<8x8xf32>
    %54 = arith.mulf %53, %44 : vector<8x8xf32>
    %55 = tpu.concatenate %48, %51, %54 in 1 : vector<8x8xf32>, vector<8x8xf32>, vector<8x8xf32> -> vector<8x24xf32>
    %56 = vector.extract_strided_slice %43 {offsets = [0, 0], sizes = [1, 1], strides = [1, 1]} : vector<1x3xf32> to vector<1x1xf32>
    %57 = vector.broadcast %56 : vector<1x1xf32> to vector<8x1xf32>
    %58 = arith.mulf %57, %45 : vector<8x1xf32>
    %59 = vector.extract_strided_slice %41 {offsets = [0, 1], sizes = [1, 1], strides = [1, 1]} : vector<3x3xf32> to vector<1x1xf32>
    %60 = vector.broadcast %59 : vector<1x1xf32> to vector<8x8xf32>
    %61 = arith.mulf %60, %44 : vector<8x8xf32>
    %62 = vector.extract_strided_slice %41 {offsets = [1, 1], sizes = [1, 1], strides = [1, 1]} : vector<3x3xf32> to vector<1x1xf32>
    %63 = vector.broadcast %62 : vector<1x1xf32> to vector<8x8xf32>
    %64 = arith.mulf %63, %44 : vector<8x8xf32>
    %65 = vector.extract_strided_slice %41 {offsets = [2, 1], sizes = [1, 1], strides = [1, 1]} : vector<3x3xf32> to vector<1x1xf32>
    %66 = vector.broadcast %65 : vector<1x1xf32> to vector<8x8xf32>
    %67 = arith.mulf %66, %44 : vector<8x8xf32>
    %68 = tpu.concatenate %61, %64, %67 in 1 : vector<8x8xf32>, vector<8x8xf32>, vector<8x8xf32> -> vector<8x24xf32>
    %69 = vector.extract_strided_slice %43 {offsets = [0, 1], sizes = [1, 1], strides = [1, 1]} : vector<1x3xf32> to vector<1x1xf32>
    %70 = vector.broadcast %69 : vector<1x1xf32> to vector<8x1xf32>
    %71 = arith.mulf %70, %45 : vector<8x1xf32>
    %72 = vector.extract_strided_slice %41 {offsets = [0, 2], sizes = [1, 1], strides = [1, 1]} : vector<3x3xf32> to vector<1x1xf32>
    %73 = vector.broadcast %72 : vector<1x1xf32> to vector<8x8xf32>
    %74 = arith.mulf %73, %44 : vector<8x8xf32>
    %75 = vector.extract_strided_slice %41 {offsets = [1, 2], sizes = [1, 1], strides = [1, 1]} : vector<3x3xf32> to vector<1x1xf32>
    %76 = vector.broadcast %75 : vector<1x1xf32> to vector<8x8xf32>
    %77 = arith.mulf %76, %44 : vector<8x8xf32>
    %78 = vector.extract_strided_slice %41 {offsets = [2, 2], sizes = [1, 1], strides = [1, 1]} : vector<3x3xf32> to vector<1x1xf32>
    %79 = vector.broadcast %78 : vector<1x1xf32> to vector<8x8xf32>
    %80 = arith.mulf %79, %44 : vector<8x8xf32>
    %81 = tpu.concatenate %74, %77, %80 in 1 : vector<8x8xf32>, vector<8x8xf32>, vector<8x8xf32> -> vector<8x24xf32>
    %82 = vector.extract_strided_slice %43 {offsets = [0, 2], sizes = [1, 1], strides = [1, 1]} : vector<1x3xf32> to vector<1x1xf32>
    %83 = vector.broadcast %82 : vector<1x1xf32> to vector<8x1xf32>
    %84 = arith.mulf %83, %45 : vector<8x1xf32>
    %85 = tpu.concatenate %55, %68, %81 in 0 : vector<8x24xf32>, vector<8x24xf32>, vector<8x24xf32> -> vector<24x24xf32>
    %c0_32 = arith.constant 0 : index
    %c0_33 = arith.constant 0 : index
    %86 = vector.load %arg5[%c0_32, %c0_33] : memref<24x24xf32, #tpu.memory_space<vmem>>, vector<24x24xf32>
    %87 = arith.addf %85, %86 : vector<24x24xf32>
    %88 = tpu.concatenate %58, %71, %84 in 0 : vector<8x1xf32>, vector<8x1xf32>, vector<8x1xf32> -> vector<24x1xf32>
    %c0_34 = arith.constant 0 : index
    %c0_35 = arith.constant 0 : index
    %c0_36 = arith.constant 0 : index
    %c0_37 = arith.constant 0 : index
    %89 = vector.load %arg1[%c0_34, %c0_35, %c0_36, %c0_37] : memref<1x3x8x1024xf32, #tpu.memory_space<vmem>>, vector<1x3x8x1024xf32>
    %90 = vector.shape_cast %89 : vector<1x3x8x1024xf32> to vector<3x8x1024xf32>
    %91 = vector.shape_cast %90 : vector<3x8x1024xf32> to vector<24x1024xf32>
    %cst_38 = arith.constant dense<0.000000e+00> : vector<24x1024xf32>
    %92 = tpu.matmul %87, %91, %cst_38 {dimension_numbers = #tpu.dot_dimension_numbers<[1], [0], [0], [1], [0, 0, 1, 1], [], []>} : vector<24x24xf32>, vector<24x1024xf32>, vector<24x1024xf32> -> vector<24x1024xf32>
    %93 = vector.broadcast %88 : vector<24x1xf32> to vector<24x1024xf32>
    %94 = arith.addf %92, %93 : vector<24x1024xf32>
    %95 = vector.shape_cast %94 : vector<24x1024xf32> to vector<1x3x8x1024xf32>
    %c0_39 = arith.constant 0 : index
    %c0_40 = arith.constant 0 : index
    %c0_41 = arith.constant 0 : index
    %c0_42 = arith.constant 0 : index
    %96 = vector.load %arg10[%c0_39, %c0_40, %c0_41, %c0_42] : memref<1x3x8x1024xf32, #tpu.memory_space<vmem>>, vector<1x3x8x1024xf32>
    tpu.vector_store %arg10[%c0_39, %c0_40, %c0_41, %c0_42], %95 {strides = array<i32>} : memref<1x3x8x1024xf32, #tpu.memory_space<vmem>>, vector<1x3x8x1024xf32>,
    return
  }
  func.func @transform_0(%arg0: i32) -> (i32, i32, i32, i32) {
    %c0_i32 = arith.constant 0 : i32
    %c0_i32_0 = arith.constant 0 : i32
    %c0_i32_1 = arith.constant 0 : i32
    %c0_i32_2 = arith.constant 0 : i32
    return %arg0, %c0_i32, %c0_i32_0, %c0_i32_1 : i32, i32, i32, i32
  }
  func.func @transform_1(%arg0: i32) -> (i32, i32) {
    %c0_i32 = arith.constant 0 : i32
    %c0_i32_0 = arith.constant 0 : i32
    %c0_i32_1 = arith.constant 0 : i32
    return %c0_i32, %c0_i32_0 : i32, i32
  }
  func.func @transform_2(%arg0: i32) -> (i32, i32) {
    %c0_i32 = arith.constant 0 : i32
    %c0_i32_0 = arith.constant 0 : i32
    %c0_i32_1 = arith.constant 0 : i32
    return %c0_i32, %c0_i32_0 : i32, i32
  }
  func.func @transform_3(%arg0: i32) -> (i32, i32) {
    %c0_i32 = arith.constant 0 : i32
    %c0_i32_0 = arith.constant 0 : i32
    %c0_i32_1 = arith.constant 0 : i32
    return %c0_i32, %c0_i32_0 : i32, i32
  }
  func.func @transform_4(%arg0: i32) -> (i32, i32) {
    %c0_i32 = arith.constant 0 : i32
    %c0_i32_0 = arith.constant 0 : i32
    %c0_i32_1 = arith.constant 0 : i32
    return %c0_i32, %c0_i32_0 : i32, i32
  }
  func.func @transform_5(%arg0: i32) -> (i32, i32) {
    %c0_i32 = arith.constant 0 : i32
    %c0_i32_0 = arith.constant 0 : i32
    %c0_i32_1 = arith.constant 0 : i32
    return %c0_i32, %c0_i32_0 : i32, i32
  }
  func.func @transform_6(%arg0: i32) -> (i32, i32) {
    %c0_i32 = arith.constant 0 : i32
    %c0_i32_0 = arith.constant 0 : i32
    %c0_i32_1 = arith.constant 0 : i32
    return %c0_i32, %c0_i32_0 : i32, i32
  }
  func.func @transform_7(%arg0: i32) -> (i32, i32) {
    %c0_i32 = arith.constant 0 : i32
    %c0_i32_0 = arith.constant 0 : i32
    %c0_i32_1 = arith.constant 0 : i32
    return %c0_i32, %c0_i32_0 : i32, i32
  }
  func.func @transform_8(%arg0: i32) -> (i32, i32) {
    %c0_i32 = arith.constant 0 : i32
    %c0_i32_0 = arith.constant 0 : i32
    %c0_i32_1 = arith.constant 0 : i32
    return %c0_i32, %c0_i32_0 : i32, i32
  }
  func.func @transform_9(%arg0: i32) -> (i32, i32, i32, i32) {
    %c0_i32 = arith.constant 0 : i32
    %c0_i32_0 = arith.constant 0 : i32
    %c0_i32_1 = arith.constant 0 : i32
    %c0_i32_2 = arith.constant 0 : i32
    return %arg0, %c0_i32, %c0_i32_0, %c0_i32_1 : i32, i32, i32, i32
  }
}

</mosaic_0001>

<bundles_post_ra>
// kernel: tpu_custom_call.1
= control target key start
LH: loop header
LB: loop body
LE: loop exit
PB: predicated region body
PF: predicated region fallthrough
CT: control target
= control target key end

     0   :  { %s1874_s0 = inlined_call_operand.hbm [shape: f32[2,3,8,1024], index: 0, kind: input, shape index: {}]   ;;  %s1875_s1 = inlined_call_operand.vmem [shape: f32[1,1024], index: 1, kind: input, shape index: {}]   ;;  %s1876_s2 = inlined_call_operand.vmem [shape: f32[8,8], index: 2, kind: input, shape index: {}]   ;;  %s1877_s3 = inlined_call_operand.vmem [shape: f32[8,1], index: 3, kind: input, shape index: {}]   ;;  %s1878_s4 = inlined_call_operand.hbm [shape: f32[24,24], index: 4, kind: input, shape index: {}]   ;;  %s1879_s5 = inlined_call_operand.vmem [shape: f32[8,8], index: 5, kind: input, shape index: {}]   ;;  %s1880_s6 = inlined_call_operand.vmem [shape: f32[8,1], index: 6, kind: input, shape index: {}]   ;;  %s1881_s7 = inlined_call_operand.hbm [shape: f32[8,8], index: 7, kind: input, shape index: {}]   ;;  %s1882_s8 = inlined_call_operand.vmem [shape: f32[8,1], index: 8, kind: input, shape index: {}]   ;;  %s1883_s9 = inlined_call_operand.hbm [shape: f32[2,3,8,1024], index: 9, kind: output, shape index: {}]  }
   0x1   :  { %1887 = sst [smem:[#allocation15_spill]] %s1878_s4 }
   0x2   :  { %1888 = sst [smem:[#allocation16_spill]] %s1881_s7 }
   0x3   :  { %14 = vsyncpa [#allocation3], 0 }
   0x4   :  { %16 = vsyncpa [#allocation3 + $0x1], 0 }
   0x5   :  { %17 = vsyncpa [#allocation6], 0 }
   0x6   :  { %18 = vsyncpa [#allocation4], 0 }
   0x7   :  { %20 = vsyncpa [#allocation4 + $0x1], 0  ;;  %s1517_s30 = smov 0   ;;  %s1519_s10 = smov 0  }
   0x8   :  { %s1521_s11 = smov 0   ;;  %s1523_s12 = smov 0  }
   0x9 LB: > { %1889 = sst [smem:[#allocation12_spill]] %s1446_s11  ;;  %s1538_s13 = sadd.s32 4294967295, %s1450_s12   ;;  %s1450_s12 = sphi %s1523_s12, %s1900_s12   ;;  %s1446_s11 = sphi %s1521_s11, %s1902_s11   ;;  %s1442_s10 = sphi %s1519_s10, %s1904_s10   ;;  %s1438_s30 = sphi %s1517_s30, %s1903_s30  }
   0xa   : > { %s1125_s14 = sadd.s32 4294967294, %s1450_s12   ;;  %p46_p0 = scmp.ne.s32.totalorder %s1442_s10, %s1438_s30 }
   0xb   : > { %p47_p1 = scmp.eq.s32.totalorder %s1538_s13, 0  ;;  %p238_p2 = scmp.eq.s32.totalorder %s1538_s13, 1 }
   0xc   : > { %p244_p3 = scmp.eq.s32.totalorder %s1125_s14, 1  ;;  %p1126_p5 = scmp.ge.s32.totalorder %s1450_s12, 1 }
   0xd   : > { %p1547_p4 = por %p47_p1, %p46_p0  ;;  %p251_p7 = scmp.lt.s32.totalorder %s1450_s12, 3 }
   0xe   : > { %p1552_p6 = por %p244_p3, %p46_p0  ;;  %s1892_s4 = sld [smem:[#allocation15_spill]] }
   0xf   : > { %p1560_p8 = pnand %p1126_p5, %p251_p7  ;;  %s1452_s21 = smov [#allocation5]  }
  0x10   : > { %s273_s22 = sshll.u32 %s1452_s21, 4  ;;  %s1894_s7 = sld [smem:[#allocation16_spill]]  ;;  %s274_s22 = int_to_ptr.vmem [resolvable:$true] %s273_s22 }
  0x11   : > { %p1214_p9 = pneg %p1560_p8  ;;  %s1453_s26 = smov 128  }
  0x12   : > { %s1454_s27 = smov 8   ;;  %s1455_s28 = smov [#allocation7]  }
  0x13   : > { %p1215_p10 = pnand %p1214_p9, %p47_p1  ;;  %s294_s29 = sshll.u32 %s1455_s28, 4  ;;  %s295_s29 = int_to_ptr.vmem [resolvable:$true] %s294_s29 }
  0x14   : > { %s271_s19 = sshll.u32 %s1892_s4, 4  ;;  %s1573_s14 = sadd.s32 1, %s1450_s12   ;;  %s272_s19 = int_to_ptr.hbm [resolvable:$true] %s271_s19 }
  0x15   : > { %1217 = dma.hbm_to_vmem [thread:$0]  (!%p1215_p10), %s272_s19, 384, %s274_s22, [#allocation6], %s1453_s26, %s1453_s26, %s1454_s27  }
  0x16   : > { %s292_s25 = sshll.u32 %s1894_s7, 4  ;;  %1895 = sst [smem:[#allocation13_spill]] %s1573_s14  ;;  %s293_s25 = int_to_ptr.hbm [resolvable:$true] %s292_s25 }
  0x17   : > { %1220 = dma.hbm_to_vmem [thread:$0]  (!%p1215_p10), %s293_s25, 128, %s295_s29, [#allocation6]  }
  0x18   : > { %s33_s17 = sadd.s32 1, %s1446_s11  ;;  %s30_s18 = ssub.s32 %s1450_s12, %s1573_s14 }
  0x19   : > { %p40_p12 = scmp.ne.s32.totalorder %s1446_s11, %s1442_s10  ;;  %p31_p13 = scmp.eq.s32.totalorder %s30_s18, 0 }
  0x1a   : > { %p41_p0 = scmp.eq.s32.totalorder %s1450_s12, 0  ;;  %p1231_p5 = scmp.lt.s32.totalorder %s1450_s12, 2 }
  0x1b   : > { %p1583_p3 = por %p238_p2, %p40_p12  ;;  %s308_s22 = sand.u32 1, %s1446_s11  }
  0x1c   : > { %s1589_s19 = scalar_select %p31_p13, %s1446_s11, %s33_s17  }
  0x1d   : > { %p42_p7 = por %p41_p0, %p40_p12  ;;  %s1180_s23 = smul.u32 192, %s308_s22 }
  0x1e   : > { %1897 = sst [smem:[#allocation14_spill]] %s1589_s19  ;;  %s1181_s24 = smul.u32 192, %s1450_s12 }
  0x1f   : > { %p1593_p9 = pnand %p1231_p5, %p42_p7  ;;  %s312_s29 = scalar_lea.vmem [#allocation2], %s1180_s23 }
  0x20   : > { %s317_s28 = scalar_lea.hbm %s1874_s0, %s1181_s24  ;;  %s320_s18 = sshll.u32 %s312_s29, 4  ;;  %s321_s18 = int_to_ptr.vmem [resolvable:$true] %s320_s18 }
  0x21   : > { %s318_s4 = sshll.u32 %s317_s28, 4  ;;  %s309_s17 = scalar_lea.sflag [#allocation3], %s308_s22  ;;  %s319_s4 = int_to_ptr.hbm [resolvable:$true] %s318_s4 }
  0x22   : > { %s1350_s7 = sshra.s32 %s319_s4, 4  ;;  %p1354_p10 = pneg %p1593_p9  ;;  %s1351_s7 = int_to_ptr.hbm [resolvable:$true] %s1350_s7 }
  0x23   : > { %s1352_s19 = scalar_lea.hbm %s1351_s7, 192  ;;  %s1357_s26 = scalar_lea.hbm %s1874_s0, 384 }
  0x24   : > { %p1353_p2 = scmp.ne.s32.totalorder %s1351_s7, %s1352_s19  ;;  %p1358_p0 = scmp.lt.s32.totalorder %s1351_s7, %s1874_s0 }
  0x25   : > { %p1359_p5 = scmp.lt.s32.totalorder %s1357_s26, %s1352_s19 }
  0x26   : > { %p1355_p12 = pnand %p1354_p10, %p1353_p2 }
  0x27   : > { %p1360_p7 = por %p1359_p5, %p1358_p0 }
  0x28   : > { %p1356_p13 = pneg %p1355_p12 }
  0x2a   : > { %p1361_p11 = pnand %p1360_p7, %p1356_p13 }
  0x2c   : > { %1364 = shalt.err (!%p1361_p11)
}
  0x2d   : > { %s1456_s22 = smov 1024   ;;  %s1457_s23 = smov 64  }
  0x2e   : > { %1224 = dma.hbm_to_vmem [thread:$0]  (!%p1593_p9), %s319_s4, 3072, %s321_s18, %s309_s17, %s1456_s22, %s1456_s22, %s1457_s23  }
  0x2f   : > { %332 = sbr.rel (%p1560_p8) target bundleno = 1443 (0x5a3), region = 56  ;;  %s1613_s11 = sand.u32 (!%p1560_p8), 1, %s1442_s10  }
  0x30   : > { %s1182_s7 = smul.u32 (!%p1560_p8), 192, %s1613_s11  ;;  %s335_s14 = scalar_lea.sflag (!%p1560_p8), [#allocation3], %s1613_s11 }
  0x32   : > { %s1619_s19 = scalar_lea.vmem (!%p1560_p8), [#allocation2], %s1182_s7 }
  0x34   : > { %1425 = dma.done.wait (%p1547_p4), %s335_s14, 3072  }
  0x35   : > { %1427 = vsyncadd (%p1547_p4), %s335_s14, 4294964224 }
  0x36   : > { %1429 = dma.done.wait (%p47_p1), [#allocation6], 512  }
  0x37   : > { %1431 = vsyncadd (%p47_p1), [#allocation6], 4294966784  ;;  %v384_v0 = vld [vmem:[%s1875_s1] sm:$0xff]  ;;  %v1634_v2 = vld [vmem:[%s1619_s19 + $0x8] sm:$0xff]  ;;  %vm479_vm0 = vcmask 7168   ;;  %vm481_vm1 = vcmask 15360  }
  0x38   : > { %v385_v1 = vld [vmem:[%s1619_s19] sm:$0xff]  ;;  %v1637_v3 = vld [vmem:[%s1619_s19 + $0x10] sm:$0xff]  ;;  %v394_v4 = vperm.slane %v384_v0, 0  ;;  %v395_v5 = vperm.slane %v384_v0, 1  ;;  %v396_v6 = vperm.slane %v384_v0, 2  ;;  %v1640_v7 = vld [vmem:[%s1619_s19 + $0x18] sm:$0xff] }
  0x39   : > { %v397_v8 = vperm.slane %v384_v0, 3  ;;  %v398_v9 = vperm.slane %v384_v0, 4  ;;  %v1134_v12 = vld [vmem:[%s1619_s19 + $0x40] sm:$0xff]  ;;  %v1645_v13 = vld [vmem:[%s1619_s19 + $0x48] sm:$0xff]  ;;  %v1648_v14 = vld [vmem:[%s1619_s19 + $0x50] sm:$0xff]  ;;  %v399_v18 = vperm.slane %v384_v0, 5 }
  0x3a   : > { %v410_v10 = vmul.f32 %v394_v4, %v385_v1  ;;  %v411_v11 = vmul.f32 %v395_v5, %v1634_v2  ;;  %v389_v15 = vld [vmem:[%s1619_s19 + $0x20] sm:$0xff]  ;;  %v412_v16 = vmul.f32 %v396_v6, %v1637_v3  ;;  %v1653_v17 = vld [vmem:[%s1619_s19 + $0x58] sm:$0xff]  ;;  %v436_v21 = vmul.f32 %v1134_v12, %v394_v4  ;;  %v1658_v23 = vld [vmem:[%s1619_s19 + $0x28] sm:$0xff]  ;;  %s1459_s26 = smov 126   ;;  %s1460_s27 = smov 127  }
  0x3b   : > { %v413_v19 = vmul.f32 %v397_v8, %v1640_v7  ;;  %v1142_v22 = vld [vmem:[%s1619_s19 + $0x80] sm:$0xff]  ;;  %v437_v24 = vmul.f32 %v1645_v13, %v395_v5  ;;  %v438_v25 = vmul.f32 %v1648_v14, %v396_v6  ;;  %v1663_v26 = vld [vmem:[%s1619_s19 + $0x88] sm:$0xff]  ;;  %v1666_v27 = vld [vmem:[%s1619_s19 + $0x90] sm:$0xff]  ;;  %v400_v28 = vperm.slane %v384_v0, 6  ;;  %s1461_s4 = smov 8   ;;  %s1462_s20 = smov 16  }
  0x3c   : > { %v418_v20 = vadd.f32 %v411_v11, %v410_v10  ;;  %798 = vmatpush.msra.mxu3 %v1142_v22  ;;  %v414_v29 = vmul.f32 %v398_v9, %v389_v15  ;;  %v1138_v31 = vld [vmem:[%s1619_s19 + $0x60] sm:$0xff]  ;;  %v439_v32 = vmul.f32 %v1653_v17, %v397_v8  ;;  %v1671_v33 = vld [vmem:[%s1619_s19 + $0x98] sm:$0xff]  ;;  %v1674_v34 = vld [vmem:[%s1619_s19 + $0x30] sm:$0xff]  ;;  %v462_v36 = vmul.f32 %v1142_v22, %v394_v4  ;;  %s1463_s23 = smov 1   ;;  %s1464_s14 = smov 2  }
  0x3d   : > { %v444_v35 = vadd.f32 %v437_v24, %v436_v21  ;;  %v463_v37 = vmul.f32 %v1663_v26, %v395_v5  ;;  %v464_v38 = vmul.f32 %v1666_v27, %v396_v6  ;;  %v401_v39 = vperm.slane %v384_v0, 7  ;;  %v1680_v42 = vld [vmem:[%s1619_s19 + $0x68] sm:$0xff]  ;;  %v1146_v43 = vld [vmem:[%s1619_s19 + $0xa0] sm:$0xff]  ;;  %v1684_v44 = vld [vmem:[%s1619_s19 + $0x38] sm:$0xff] }
  0x3e   : > { %v419_v30 = vadd.f32 %v418_v20, %v412_v16  ;;  %799 = vmatpush.msra.mxu3 %v1134_v12  ;;  %v415_v40 = vmul.f32 %v399_v18, %v1658_v23  ;;  %v440_v45 = vmul.f32 %v1138_v31, %v398_v9  ;;  %v465_v47 = vmul.f32 %v1671_v33, %v397_v8  ;;  %v1147_v51 = vld [vmem:[%s1619_s19 + $0xa8] sm:$0xff]  ;;  %v1140_v52 = vld [vmem:[%s1619_s19 + $0x70] sm:$0xff]  ;;  %v1141_v4 = vld [vmem:[%s1619_s19 + $0x78] sm:$0xff] }
  0x3f   : > { %v445_v46 = vadd.f32 %v444_v35, %v438_v25  ;;  %v470_v48 = vadd.f32 %v463_v37, %v462_v36  ;;  %v416_v49 = vmul.f32 %v400_v28, %v1674_v34  ;;  %v441_v53 = vmul.f32 %v1680_v42, %v399_v18  ;;  %v1148_v59 = vld [vmem:[%s1619_s19 + $0xb0] sm:$0xff]  ;;  %v515_v21 = vld [vmem:[%s1882_s8] sm:$0xff] }
  0x40   : > { %v420_v41 = vadd.f32 %v419_v30, %v413_v19  ;;  %800 = vmatpush.msra.mxu3 %v385_v1  ;;  %v466_v55 = vmul.f32 %v1146_v43, %v398_v9  ;;  %v417_v57 = vmul.f32 %v401_v39, %v1684_v44  ;;  %v467_v61 = vmul.f32 %v1147_v51, %v399_v18  ;;  %v1694_v1 = vld [vmem:[%s1619_s19 + $0xb8] sm:$0xff]  ;;  %v483_v30 = vld [vmem:[%s1879_s5] sm:$0xff] }
  0x41   : > { %v446_v54 = vadd.f32 %v445_v46, %v439_v32  ;;  %v471_v56 = vadd.f32 %v470_v48, %v464_v38  ;;  %v442_v0 = vmul.f32 %v1140_v52, %v400_v28  ;;  %v468_v6 = vmul.f32 %v1148_v59, %v400_v28 }
  0x42   : > { %v421_v50 = vadd.f32 %v420_v41, %v414_v29  ;;  %902 = vmatpush.msrb.mxu3 %v1146_v43  ;;  %v469_v9 = vmul.f32 %v1694_v1, %v401_v39  ;;  %v443_v12 = vmul.f32 %v1141_v4, %v401_v39  ;;  %v1458_v22 = vmov 0  }
  0x43   : > { %v447_v60 = vadd.f32 %v446_v54, %v440_v45  ;;  %v472_v62 = vadd.f32 %v471_v56, %v465_v47  ;;  %1283 = vset.pattern.permute.xlu1 %v1458_v22  ;;  %1284 = vset.pattern.permute.xlu2 %v1458_v22  ;;  %vm490_vm2 = vcmask 64512   ;;  %vm600_vm3 = vcmask 18432  }
  0x44   : > { %v422_v58 = vadd.f32 %v421_v50, %v415_v40  ;;  %903 = vmatpush.msrb.mxu3 %v1138_v31  ;;  %518 = vperm.xlu2 %1284, %v515_v21   ;;  %v514_v31 = vld [vmem:[#allocation7] sm:$0xff]  ;;  %vm658_vm8 = vcmask 130048   ;;  %vm775_vm9 = vcmask 195584  }
  0x45   : > { %v448_v5 = vadd.f32 %v447_v60, %v441_v53  ;;  %v473_v8 = vadd.f32 %v472_v62, %v466_v55  ;;  %1285 = vset.pattern.permute.xlu0 %v1458_v22  ;;  %v1742_v53 = vld [vmem:[%s1876_s2] sm:$0xff] }
  0x46   : > { %v423_v63 = vadd.f32 %v422_v58, %v416_v49  ;;  %904 = vmatpush.msrb.mxu3 %v389_v15  ;;  %v484_v15 = vld [vmem:[%s1880_s6] sm:$0xff] }
  0x47   : > { %v474_v11 = vadd.f32 %v473_v8, %v467_v61  ;;  %v449_v16 = vadd.f32 %v448_v5, %v442_v0  ;;  %v633_v22 = vld [vmem:[%s1877_s3] sm:$0xff] }
  0x48   : > { %v424_v10 = vadd.f32 %v423_v63, %v417_v57 }
  0x49   : > { %v475_v19 = vadd.f32 %v474_v11, %v468_v6  ;;  %v450_v18 = vadd.f32 %v449_v16, %v443_v12  ;;  %v726_v6 = vld [vmem:[#allocation5] sm:$0xff] }
  0x4a   : > { %425 = vadd.xlane.f32.xlu0 %v424_v10 }
  0x4b   : > { %v476_v20 = vadd.f32 %v475_v19, %v469_v9 }
  0x4d   : > { %477 = vadd.xlane.f32.xlu1 %v476_v20 }
  0x52   : > { %451 = vadd.xlane.f32.xlu0 %v450_v18 }
  0x66   : > { %487 = vperm.xlu1 %1283, %v484_v15  }
  0x9e   : > { %v519_v35 = vpop.permute.xlu2 %518 }
  0xbd   : > { %v426_v24 = vpop.xlane.xlu0 %425 }
  0xc0   : > { %v478_v25 = vpop.xlane.xlu1 %477 }
  0xc5   : > { %v452_v28 = vpop.xlane.xlu0 %451 }
  0xc6   : > { %v480_v29 = vsel %vm479_vm0, %v426_v24, %v452_v28 }
  0xc7   : > { %v482_v32 = vsel %vm481_vm1, %v480_v29, %v478_v25 }
  0xc8   : > { %509 = vmatpush.msra.mxu0 %v482_v32  ;;  %539 = vmatpush.msra.mxu1 %v482_v32 }
  0xc9   : > { %1150 = vmatmul.msk.f32.vlgmr.msra.gmra.mxu0 %vm490_vm2, %v483_v30  ;;  %1151 = vmatmul.msk.f32.vlgmr.msra.gmra.mxu1 %vm490_vm2, %v514_v31  ;;  %v727_v31 = vld [vmem:[#allocation5 + $0x8] sm:$0xff] }
  0xca   : > { %824 = vmatpush.msrb.mxu0 %v1663_v26  ;;  %850 = vmatpush.msrb.mxu1 %v1666_v27 }
  0xcc   : > { %825 = vmatpush.msrb.mxu0 %v1645_v13  ;;  %851 = vmatpush.msrb.mxu1 %v1648_v14 }
  0xce   : > { %826 = vmatpush.msrb.mxu0 %v1634_v2  ;;  %852 = vmatpush.msrb.mxu1 %v1637_v3 }
  0xd0   : > { %928 = vmatpush.msra.mxu0 %v1147_v51  ;;  %954 = vmatpush.msra.mxu1 %v1148_v59 }
  0xd2   : > { %929 = vmatpush.msra.mxu0 %v1680_v42  ;;  %955 = vmatpush.msra.mxu1 %v1140_v52 }
  0xd4   : > { %930 = vmatpush.msra.mxu0 %v1658_v23  ;;  %956 = vmatpush.msra.mxu1 %v1674_v34 }
  0xd8   : > { %v488_v26 = vpop.permute.xlu1 %487 }
 0x146   : > { %v511_v27 = vpop.f32.mrf.mxu0  ;;  %v541_v36 = vpop.f32.mrf.mxu1 }
 0x147   : > { %v512_v13 = vadd.f32 %v511_v27, %v488_v26  ;;  %v542_v37 = vadd.f32 %v541_v36, %v519_v35 }
 0x149   : > { %544 = vxpose.xlu2.b32.start.end [1/1] (short) (narrow) %v512_v13, 8  ;;  %594 = vmatpush.msra.mxu2 %v542_v37 }
 0x14b   : > { %876 = vmatpush.msrb.mxu2 %v1671_v33 }
 0x14d   : > { %877 = vmatpush.msrb.mxu2 %v1653_v17 }
 0x14f   : > { %878 = vmatpush.msrb.mxu2 %v1640_v7 }
 0x1e2   : > { %v560_v2 = vpop.trf.xlu2 }
 0x1e3   : > { %1152 = vmatmul.msk.f32.vlgmr.msra.gmra.mxu2 %vm490_vm2, %v560_v2 }
 0x1e4   : > { %980 = vmatpush.msra.mxu2 %v1694_v1 }
 0x1e6   : > { %981 = vmatpush.msra.mxu2 %v1141_v4 }
 0x1e8   : > { %982 = vmatpush.msra.mxu2 %v1684_v44 }
 0x266   : > { %v596_v3 = vpop.f32.mrf.mxu2 }
 0x267   : > { %v599_v14 = vmul.f32 0.125, %v596_v3 }
 0x269   : > { %v601_v23 = vsel %vm600_vm3, %v599_v14, -inf }
 0x26a   : > { %602 = vmax.xlane.f32.xlu0 %v601_v23 }
 0x2dd   : > { %v603_v34 = vpop.xlane.xlu0 %602 }
 0x2de   : > { %v604_v33 = vsub.f32 %v599_v14, %v603_v34  ;;  %v728_v14 = vld [vmem:[#allocation5 + $0x10] sm:$0xff] }
 0x2e0   : > { %v605_v38 = vmul.f32 1.442695, %v604_v33 }
 0x2e2   : > { %1286 = vpow2.f32 %v605_v38 }
 0x2e8   : > { %v1287_v17 = vpop.eup %1286 }
 0x2e9   : > { %v607_v7 = vsel %vm600_vm3, %v1287_v17, 0.0 }
 0x2ea   : > { %608 = vadd.xlane.f32.xlu0 %v607_v7 }
 0x35d   : > { %v609_v39 = vpop.xlane.xlu0 %608 }
 0x35e   : > { %1288 = vrcp.f32 %v609_v39  ;;  %v621_v43 = vand.u32 2147483648, %v609_v39  ;;  %v619_v45 = vand.u32 2147483647, %v609_v39  ;;  %vm615_vm5 = vweird.f32 %v609_v39 }
 0x360   : > { %v622_v47 = vor.u32 1.1754944e-38, %v621_v43  ;;  %vm620_vm7 = vcmp.eq.f32.partialorder %v619_v45, 8.507059e+37 }
 0x364   : > { %v1289_v40 = vpop.eup %1288 }
 0x365   : > { %v611_v41 = vmul.f32 %v1289_v40, %v609_v39  ;;  %vm616_vm4 = vweird.f32 %v1289_v40 }
 0x366   : > { %vm617_vm6 = vmor %vm615_vm5, %vm616_vm4 }
 0x367   : > { %v612_v42 = vsub.f32 1.0, %v611_v41 }
 0x369   : > { %v613_v44 = vmul.f32 %v1289_v40, %v612_v42 }
 0x36b   : > { %v614_v46 = vadd.f32 %v1289_v40, %v613_v44 }
 0x36d   : > { %v618_v48 = vsel %vm617_vm6, %v1289_v40, %v614_v46 }
 0x36e   : > { %v623_v49 = vsel %vm620_vm7, %v622_v47, %v618_v48 }
 0x36f   : > { %v1726_v50 = vmul.f32 %v1287_v17, %v623_v49 }
 0x371   : > { %694 = vrot.lane.b32.xlu2 %v1726_v50, %s1459_s26  ;;  %661 = vrot.lane.b32.xlu0 %v1726_v50, %s1460_s27  ;;  %1183 = vpush %v1726_v50  ;;  %v639_v51 = vrot.slane %v1726_v50, 1  ;;  %v644_v52 = vrot.slane %v1726_v50, 2  ;;  %v625_v24 = vsel %vm600_vm3, %v1726_v50, 0.0 }
 0x372   : > { %v626_v28 = vrot.slane %v625_v24, 4 }
 0x373   : > { %667 = vrot.lane.b32.xlu1 %v639_v51, %s1460_s27  ;;  %1185 = vpush %v639_v51 }
 0x374   : > { %1187 = vpush %v644_v52  ;;  %v627_v32 = vadd.f32 %v626_v28, %v625_v24 }
 0x376   : > { %v628_v13 = vrot.slane %v627_v32, 2 }
 0x378   : > { %v629_v3 = vadd.f32 %v628_v13, %v627_v32 }
 0x379   : > { %706 = vrot.lane.b32.xlu0 %v644_v52, %s1459_s26 }
 0x37a   : > { %v630_v7 = vrot.slane %v629_v3, 1 }
 0x37b   : > { %673 = vrot.lane.b32.xlu1 %v644_v52, %s1460_s27 }
 0x37c   : > { %v631_v39 = vadd.f32 %v630_v7, %v629_v3 }
 0x37e   : > { %v660_v44 = vmul.f32 %v633_v22, %v631_v39 }
 0x383   : > { %700 = vrot.lane.b32.xlu1 %v639_v51, %s1459_s26 }
 0x3a2   : > { %s1184_s24 = spop %1183 }
 0x3a3   : > { %v636_v0 = vstv %s1184_s24 }
 0x3a4   : > { %s1186_s22 = spop %1185  ;;  %v638_v4 = vmul.f32 %v636_v0, %v1742_v53 }
 0x3a5   : > { %v641_v54 = vstv %s1186_s22  ;;  %s1188_s19 = spop %1187 }
 0x3a6   : > { %v643_v55 = vmul.f32 %v641_v54, %v1742_v53  ;;  %v646_v56 = vstv %s1188_s19 }
 0x3a7   : > { %v648_v57 = vmul.f32 %v646_v56, %v1742_v53 }
 0x3a8   : > { %650 = vrot.lane.b32.xlu1 %v643_v55, %s1461_s4 }
 0x3a9   : > { %654 = vrot.lane.b32.xlu0 %v648_v57, %s1462_s20 }
 0x3cb   : > { %v695_v61 = vpop.permute.xlu2 %694 }
 0x3e3   : > { %v662_v58 = vpop.permute.xlu0 %661 }
 0x3e4   : > { %1189 = vpush %v662_v58 }
 0x3e5   : > { %v668_v59 = vpop.permute.xlu1 %667 }
 0x3e6   : > { %1191 = vpush %v668_v59 }
 0x3eb   : > { %v707_v63 = vpop.permute.xlu0 %706 }
 0x3ed   : > { %v674_v60 = vpop.permute.xlu1 %673 }
 0x3ee   : > { %1193 = vpush %v674_v60 }
 0x3ef   : > { %1195 = vpush %v695_v61 }
 0x3f5   : > { %v701_v62 = vpop.permute.xlu1 %700 }
 0x3f6   : > { %1197 = vpush %v701_v62 }
 0x3f7   : > { %1199 = vpush %v707_v63 }
 0x415   : > { %s1748_s15 = spop %1189 }
 0x416   : > { %v664_v25 = vstv %s1748_s15  ;;  %s1018_s15 = scalar_lea.sflag [#allocation4], %s1613_s11 }
 0x417   : > { %s1192_s25 = spop %1191  ;;  %v666_v30 = vmul.f32 %v664_v25, %v1742_v53 }
 0x418   : > { %v670_v1 = vstv %s1192_s25 }
 0x419   : > { %v672_v5 = vmul.f32 %v670_v1, %v1742_v53 }
 0x41a   : > { %v651_v8 = vpop.permute.xlu1 %650 }
 0x41b   : > { %v655_v10 = vpop.permute.xlu0 %654  ;;  %v657_v9 = vsel %vm490_vm2, %v638_v4, %v651_v8  ;;  %680 = vrot.lane.b32.xlu1 %v672_v5, %s1461_s4 }
 0x41c   : > { %v659_v11 = vsel %vm658_vm8, %v657_v9, %v655_v10 }
 0x41d   : > { %v1755_v12 = vadd.f32 %v726_v6, %v659_v11 }
 0x41f   : > { %s1194_s28 = spop %1193  ;;  %1153 = vmatmul.msk.f32.vlgmr.msra.gmra.mxu3 %vm775_vm9, %v1755_v12  ;;  %1156 = vmatmul.msk.f32.vlgmr.msrb.gmra.mxu0 %vm775_vm9, %v1755_v12 }
 0x420   : > { %v676_v16 = vstv %s1194_s28  ;;  %1159 = vmatmul.msk.f32.vlgmr.msrb.gmra.mxu1 %vm775_vm9, %v1755_v12  ;;  %1162 = vmatmul.msk.f32.vlgmr.msrb.gmra.mxu2 %vm775_vm9, %v1755_v12  ;;  %s1767_s29 = spop %1195 }
 0x421   : > { %v678_v19 = vmul.f32 %v676_v16, %v1742_v53  ;;  %v697_v37 = vstv %s1767_s29 }
 0x422   : > { %v699_v2 = vmul.f32 %v697_v37, %v1742_v53 }
 0x423   : > { %684 = vrot.lane.b32.xlu0 %v678_v19, %s1462_s20 }
 0x427   : > { %s1198_s18 = spop %1197 }
 0x428   : > { %v703_v20 = vstv %s1198_s18  ;;  %s1200_s17 = spop %1199 }
 0x429   : > { %v705_v18 = vmul.f32 %v703_v20, %v1742_v53  ;;  %v709_v15 = vstv %s1200_s17  ;;  %s1400_s17 = scalar_lea.hbm %s1883_s9, 384 }
 0x42a   : > { %v711_v21 = vmul.f32 %v709_v15, %v1742_v53 }
 0x42b   : > { %713 = vrot.lane.b32.xlu1 %v705_v18, %s1461_s4 }
 0x42c   : > { %717 = vrot.lane.b32.xlu0 %v711_v21, %s1462_s20 }
 0x433   : > { %690 = vrot.lane.b32.xlu1 %v633_v22, %s1463_s23 }
 0x434   : > { %722 = vrot.lane.b32.xlu0 %v633_v22, %s1464_s14 }
 0x48d   : > { %v681_v29 = vpop.permute.xlu1 %680 }
 0x48e   : > { %v687_v26 = vsel %vm490_vm2, %v666_v30, %v681_v29 }
 0x495   : > { %v685_v35 = vpop.permute.xlu0 %684 }
 0x496   : > { %v688_v27 = vsel %vm658_vm8, %v687_v26, %v685_v35 }
 0x497   : > { %v730_v36 = vadd.f32 %v727_v31, %v688_v27 }
 0x499   : > { %1154 = vmatmul.msk.f32.gmra.mxu3 %vm775_vm9, %v730_v36  ;;  %1157 = vmatmul.msk.f32.gmra.mxu0 %vm775_vm9, %v730_v36 }
 0x49a   : > { %1160 = vmatmul.msk.f32.gmra.mxu1 %vm775_vm9, %v730_v36  ;;  %1163 = vmatmul.msk.f32.gmra.mxu2 %vm775_vm9, %v730_v36 }
 0x49c   : > { %v828_v45 = vpop.f32.mrf.mxu0 }
 0x49d   : > { %v714_v23 = vpop.permute.xlu1 %713  ;;  %v854_v46 = vpop.f32.mrf.mxu1 }
 0x49e   : > { %v718_v34 = vpop.permute.xlu0 %717  ;;  %v720_v33 = vsel %vm490_vm2, %v699_v2, %v714_v23 }
 0x49f   : > { %v721_v38 = vsel %vm658_vm8, %v720_v33, %v718_v34 }
 0x4a0   : > { %v731_v17 = vadd.f32 %v728_v14, %v721_v38 }
 0x4a2   : > { %1155 = vmatmul.msk.f32.gmra.mxu3 %vm775_vm9, %v731_v17  ;;  %1158 = vmatmul.msk.f32.gmra.mxu0 %vm775_vm9, %v731_v17  ;;  %v802_v47 = vpop.f32.mrf.mxu3 }
 0x4a3   : > { %1161 = vmatmul.msk.f32.gmra.mxu1 %vm775_vm9, %v731_v17  ;;  %1164 = vmatmul.msk.f32.gmra.mxu2 %vm775_vm9, %v731_v17  ;;  %v880_v48 = vpop.f32.mrf.mxu2 }
 0x4a5   : > { %v691_v40 = vpop.permute.xlu1 %690 }
 0x4a6   : > { %v723_v41 = vpop.permute.xlu0 %722  ;;  %v693_v42 = vmul.f32 %v691_v40, %v631_v39 }
 0x4a7   : > { %v725_v43 = vmul.f32 %v723_v41, %v631_v39 }
 0x4a8   : > { %733 = vrot.lane.b32.xlu1 %v693_v42, %s1460_s27 }
 0x4a9   : > { %736 = vrot.lane.b32.xlu0 %v725_v43, %s1459_s26  ;;  %s1814_s26 = scalar_lea.vmem [#allocation8], %s1182_s7  ;;  %s1201_s7 = smul.u32 192, %s1538_s13 }
 0x4aa   : > { %1165 = vmatmul.msk.f32.vlgmr.msrb.gmra.mxu3 %vm775_vm9, %v1755_v12  ;;  %1168 = vmatmul.msk.f32.vlgmr.msra.gmra.mxu0 %vm775_vm9, %v1755_v12  ;;  %s1030_s13 = sshll.u32 %s1814_s26, 4  ;;  %s1031_s13 = int_to_ptr.vmem [resolvable:$true] %s1030_s13 }
 0x4ab   : > { %1171 = vmatmul.msk.f32.vlgmr.msra.gmra.mxu1 %vm775_vm9, %v1755_v12  ;;  %1174 = vmatmul.msk.f32.vlgmr.msra.gmra.mxu2 %vm775_vm9, %v1755_v12  ;;  %s1029_s4 = scalar_lea.hbm %s1883_s9, %s1201_s7 }
 0x4ac   : > { %s1032_s20 = sshll.u32 %s1029_s4, 4  ;;  %s1033_s20 = int_to_ptr.hbm [resolvable:$true] %s1032_s20 }
 0x4ad   : > { %s1394_s25 = sshra.s32 %s1033_s20, 4  ;;  %s1395_s25 = int_to_ptr.hbm [resolvable:$true] %s1394_s25 }
 0x4ae   : > { %s1396_s28 = scalar_lea.hbm %s1395_s25, 192  ;;  %p1401_p11 = scmp.lt.s32.totalorder %s1395_s25, %s1883_s9 }
 0x4af   : > { %p1397_p1 = scmp.ne.s32.totalorder %s1395_s25, %s1396_s28  ;;  %p1402_p9 = scmp.lt.s32.totalorder %s1400_s17, %s1396_s28 }
 0x4b0   : > { %764 = vperm.xlu1 %1283, %v660_v44  }
 0x4b1   : > { %p1398_p4 = pnand %p1397_p1, %p1583_p3  ;;  %p1403_p2 = por %p1402_p9, %p1401_p11 }
 0x4b2   : > { %1166 = vmatmul.msk.f32.gmra.mxu3 %vm775_vm9, %v730_v36  ;;  %1169 = vmatmul.msk.f32.gmra.mxu0 %vm775_vm9, %v730_v36 }
 0x4b3   : > { %1172 = vmatmul.msk.f32.gmra.mxu1 %vm775_vm9, %v730_v36  ;;  %1175 = vmatmul.msk.f32.gmra.mxu2 %vm775_vm9, %v730_v36  ;;  %p1399_p8 = pneg %p1398_p4 }
 0x4b5   : > { %p1404_p10 = pnand %p1403_p2, %p1399_p8 }
 0x4ba   : > { %1167 = vmatmul.msk.f32.gmra.mxu3 %vm775_vm9, %v731_v17  ;;  %1170 = vmatmul.msk.f32.gmra.mxu0 %vm775_vm9, %v731_v17 }
 0x4bb   : > { %1173 = vmatmul.msk.f32.gmra.mxu1 %vm775_vm9, %v731_v17  ;;  %1176 = vmatmul.msk.f32.gmra.mxu2 %vm775_vm9, %v731_v17 }
 0x516   : > { %v831_v49 = vpop.f32.mrf.mxu0 }
 0x517   : > { %v857_v50 = vpop.f32.mrf.mxu1 }
 0x51a   : > { %v734_v51 = vpop.permute.xlu1 %733 }
 0x51b   : > { %v737_v52 = vpop.permute.xlu0 %736  ;;  %768 = vperm.xlu0 %1285, %v734_v51  }
 0x51c   : > { %772 = vperm.xlu1 %1283, %v737_v52   ;;  %v805_v53 = vpop.f32.mrf.mxu3 }
 0x51d   : > { %v883_v54 = vpop.f32.mrf.mxu2 }
 0x51f   : > { %v834_v55 = vpop.f32.mrf.mxu0 }
 0x520   : > { %v860_v56 = vpop.f32.mrf.mxu1 }
 0x522   : > { %v765_v57 = vpop.permute.xlu1 %764 }
 0x523   : > { %v803_v58 = vadd.f32 %v802_v47, %v765_v57  ;;  %v829_v59 = vadd.f32 %v828_v45, %v765_v57  ;;  %v855_v60 = vadd.f32 %v854_v46, %v765_v57  ;;  %v881_v61 = vadd.f32 %v880_v48, %v765_v57 }
 0x525   : > { %993 = vst [vmem:[%s1814_s26] sm:$0xff] %v803_v58  ;;  %v808_v62 = vpop.f32.mrf.mxu3 }
 0x526   : > { %994 = vst [vmem:[%s1814_s26 + $0x8] sm:$0xff] %v829_v59  ;;  %v886_v63 = vpop.f32.mrf.mxu2 }
 0x527   : > { %995 = vst [vmem:[%s1814_s26 + $0x10] sm:$0xff] %v855_v60  ;;  %v932_v0 = vpop.f32.mrf.mxu0 }
 0x528   : > { %996 = vst [vmem:[%s1814_s26 + $0x18] sm:$0xff] %v881_v61  ;;  %v933_v1 = vadd.f32 %v932_v0, %v765_v57  ;;  %v958_v4 = vpop.f32.mrf.mxu1 }
 0x529   : > { %v959_v5 = vadd.f32 %v958_v4, %v765_v57 }
 0x52a   : > { %998 = vst [vmem:[%s1814_s26 + $0x28] sm:$0xff] %v933_v1 }
 0x52b   : > { %999 = vst [vmem:[%s1814_s26 + $0x30] sm:$0xff] %v959_v5 }
 0x52d   : > { %v906_v6 = vpop.f32.mrf.mxu3 }
 0x52e   : > { %v907_v8 = vadd.f32 %v906_v6, %v765_v57  ;;  %v984_v10 = vpop.f32.mrf.mxu2 }
 0x52f   : > { %v985_v9 = vadd.f32 %v984_v10, %v765_v57  ;;  %v935_v16 = vpop.f32.mrf.mxu0 }
 0x530   : > { %997 = vst [vmem:[%s1814_s26 + $0x20] sm:$0xff] %v907_v8  ;;  %v961_v15 = vpop.f32.mrf.mxu1 }
 0x531   : > { %1000 = vst [vmem:[%s1814_s26 + $0x38] sm:$0xff] %v985_v9 }
 0x535   : > { %v909_v11 = vpop.f32.mrf.mxu3 }
 0x536   : > { %v987_v22 = vpop.f32.mrf.mxu2 }
 0x537   : > { %v938_v36 = vpop.f32.mrf.mxu0 }
 0x538   : > { %v964_v37 = vpop.f32.mrf.mxu1 }
 0x53d   : > { %v912_v35 = vpop.f32.mrf.mxu3 }
 0x53e   : > { %v990_v3 = vpop.f32.mrf.mxu2 }
 0x58d   : > { %v769_v12 = vpop.permute.xlu0 %768 }
 0x58e   : > { %v806_v19 = vadd.f32 %v805_v53, %v769_v12  ;;  %v832_v20 = vadd.f32 %v831_v49, %v769_v12  ;;  %v858_v18 = vadd.f32 %v857_v50, %v769_v12  ;;  %v884_v21 = vadd.f32 %v883_v54, %v769_v12  ;;  %v773_v28 = vpop.permute.xlu1 %772 }
 0x58f   : > { %v910_v24 = vadd.f32 %v909_v11, %v769_v12  ;;  %v936_v25 = vadd.f32 %v935_v16, %v769_v12  ;;  %v962_v29 = vadd.f32 %v961_v15, %v769_v12  ;;  %v988_v30 = vadd.f32 %v987_v22, %v769_v12 }
 0x590   : > { %1001 = vst [vmem:[%s1814_s26 + $0x40] sm:$0xff] %v806_v19  ;;  %v809_v31 = vadd.f32 %v808_v62, %v773_v28  ;;  %v835_v32 = vadd.f32 %v834_v55, %v773_v28  ;;  %v861_v26 = vadd.f32 %v860_v56, %v773_v28  ;;  %v887_v27 = vadd.f32 %v886_v63, %v773_v28 }
 0x591   : > { %1002 = vst [vmem:[%s1814_s26 + $0x48] sm:$0xff] %v832_v20  ;;  %v913_v13 = vadd.f32 %v912_v35, %v773_v28  ;;  %v939_v2 = vadd.f32 %v938_v36, %v773_v28  ;;  %v965_v14 = vadd.f32 %v964_v37, %v773_v28  ;;  %v991_v23 = vadd.f32 %v990_v3, %v773_v28 }
 0x592   : > { %1003 = vst [vmem:[%s1814_s26 + $0x50] sm:$0xff] %v858_v18 }
 0x593   : > { %1004 = vst [vmem:[%s1814_s26 + $0x58] sm:$0xff] %v884_v21 }
 0x594   : > { %1005 = vst [vmem:[%s1814_s26 + $0x60] sm:$0xff] %v910_v24 }
 0x595   : > { %1006 = vst [vmem:[%s1814_s26 + $0x68] sm:$0xff] %v936_v25 }
 0x596   : > { %1007 = vst [vmem:[%s1814_s26 + $0x70] sm:$0xff] %v962_v29 }
 0x597   : > { %1008 = vst [vmem:[%s1814_s26 + $0x78] sm:$0xff] %v988_v30 }
 0x598   : > { %1009 = vst [vmem:[%s1814_s26 + $0x80] sm:$0xff] %v809_v31 }
 0x599   : > { %1010 = vst [vmem:[%s1814_s26 + $0x88] sm:$0xff] %v835_v32 }
 0x59a   : > { %1011 = vst [vmem:[%s1814_s26 + $0x90] sm:$0xff] %v861_v26 }
 0x59b   : > { %1012 = vst [vmem:[%s1814_s26 + $0x98] sm:$0xff] %v887_v27 }
 0x59c   : > { %1013 = vst [vmem:[%s1814_s26 + $0xa0] sm:$0xff] %v913_v13 }
 0x59d   : > { %1014 = vst [vmem:[%s1814_s26 + $0xa8] sm:$0xff] %v939_v2 }
 0x59e   : > { %1015 = vst [vmem:[%s1814_s26 + $0xb0] sm:$0xff] %v965_v14 }
 0x59f   : > { %1016 = vst [vmem:[%s1814_s26 + $0xb8] sm:$0xff] %v991_v23 }
 0x5a0   : > { %1407 = shalt.err (!%p1404_p10)
}
 0x5a1   : > { %s1465_s11 = smov 1024   ;;  %s1466_s23 = smov 64  }
 0x5a2   : > { %1212 = dma.vmem_to_hbm [thread:$0]  (%p1583_p3), %s1031_s13, 3072, %s1033_s20, %s1018_s15, %s1465_s11, %s1465_s11, %s1466_s23  }
 0x5a3 PF: > { %s1047_s14 = sand.u32 1, %s1438_s30   ;;  %p1899_p12 = scmp.ge.s32.totalorder %s1450_s12, 2 }
 0x5a4   : > { %s1048_s26 = scalar_lea.sflag [#allocation4], %s1047_s14 }
 0x5a5   : > { %p1226_p13 = pnand %p1899_p12, %p1552_p6 }
 0x5a7   : > { %p1227_p0 = pneg %p1226_p13 }
 0x5a9   : > { %1433 = dma.done.wait (%p1227_p0), %s1048_s26, 3072  }
 0x5aa   : > { %1435 = vsyncadd (%p1227_p0), %s1048_s26, 4294964224  ;;  %s1900_s12 = sld [smem:[#allocation13_spill]]  ;;  %s1903_s30 = smov %s1442_s10 }
 0x5ab   : > { %s1901_s7 = sld [smem:[#allocation12_spill]] }
 0x5ac   : > { %s1902_s11 = sld [smem:[#allocation14_spill]] }
 0x5b0   : > { %p23_p5 = scmp.ge.s32.totalorder %s1900_s12, 4  }
 0x5b1   : > { %s1904_s10 = smov %s1901_s7 }
 0x5b2   :  { %25 = sbr.rel (!%p23_p5) target bundleno = 9 (0x9), region = 111 }
 0x5b7   :  { %1054 = vsyncpa [#allocation3], 1 }
 0x5b8   :  { %1056 = vsyncpa [#allocation3 + $0x1], 1 }
 0x5b9   :  { %1057 = vsyncpa [#allocation6], 1 }
 0x5ba   :  { %1058 = vsyncpa [#allocation4], 1 }
 0x5bb   :  { %1060 = vsyncpa [#allocation4 + $0x1], 1 }

</bundles_post_ra>
